<compile_context>
chip_gen: v5e
topology: v5e:2x2
jax: 0.10.0
libtpu: 0.0.40
codegen_flags: <defaults>
</compile_context>

<pallas_src>
import functools

import jax
import jax.numpy as jnp
from jax import lax
from jax.experimental import pallas as pl
from jax.experimental.pallas import tpu as pltpu

# OGB vocabulary sizes (ogb.utils.features)
ATOM_FEATURE_DIMS = [119, 5, 12, 12, 10, 6, 6, 2, 2]
BOND_FEATURE_DIMS = [5, 6, 2]

BN_EPS = 1e-5
LANE = 128
SUBLANE = 8


def _round_up(x, m):
    return ((x + m - 1) // m) * m


# ---------------------------------------------------------------------------
# Fused GIN layer kernel, grid = (node tiles, max edge-blocks per tile):
#   agg = scatter_add(msg -> target nodes)   (MXU, per-tile one-hot matmul, f32 acc)
#     where msg = relu(x_j + bond_emb) was fused into one bf16 stream in the wrapper
#   z   = (1 + eps) * h + agg
#   t   = relu(z @ W1' + b1')                (BN1 folded into W1'/b1')
#   out = t @ W2' + b2'                      (outer BN folded into W2'/b2'), + relu if not last
# ---------------------------------------------------------------------------
def gin_layer_kernel(bstart_ref, bcount_ref,                     # scalar prefetch (SMEM)
                     col_ref, msg_ref, h_ref,
                     w1_ref, b1_ref, w2_ref, b2_ref, eps_ref,
                     out_ref, acc_ref, *, apply_relu, tm):
    i = pl.program_id(0)                                         # node tile   (parallel)
    k = pl.program_id(1)                                         # edge block  (reduction)

    @pl.when(k == 0)
    def _init():
        acc_ref[...] = jnp.zeros_like(acc_ref)

    # Only the bcount[i] edge blocks that actually target this node tile contribute.
    @pl.when(k < bcount_ref[i])
    def _accumulate():
        # Local one-hot scatter block for aggr='add': compare a (tm,1) sublane iota
        # against the tile-relative target ids (1,tk) -> (tm,tk) bf16, feed the MXU.
        col_rel = col_ref[...] - i * tm                                   # (1, tk) i32
        node_iota = lax.broadcasted_iota(jnp.int32, (tm, 1), 0)           # (tm, 1) i32
        onehot = (node_iota == col_rel).astype(jnp.bfloat16)              # (tm, tk)
        acc_ref[...] += jnp.dot(onehot, msg_ref[...],
                                preferred_element_type=jnp.float32)

    @pl.when(k == pl.num_programs(1) - 1)
    def _finalize():
        z = (1.0 + eps_ref[0]) * h_ref[...].astype(jnp.float32) + acc_ref[...]
        t = jnp.dot(z.astype(jnp.bfloat16), w1_ref[...],
                    preferred_element_type=jnp.float32) + b1_ref[...]
        t = jnp.maximum(t, 0.0)
        o = jnp.dot(t.astype(jnp.bfloat16), w2_ref[...],
                    preferred_element_type=jnp.float32) + b2_ref[...]
        if apply_relu:
            o = jnp.maximum(o, 0.0)
        out_ref[...] = o.astype(out_ref.dtype)


def gin_layer(col2d, msg, h_pad, w1, b1, w2, b2, eps,
              bstart, bcount, max_bcount, *, tm, tk, apply_relu):
    n_pad, dp = h_pad.shape
    hp = w1.shape[1]
    n_tiles = n_pad // tm

    def _eblk(i, k, bs, bc):
        # Clamp into this node tile's edge-block range: out-of-range steps re-use the
        # previous block index (no new DMA); their compute is masked by pl.when above.
        kk = jnp.minimum(k, jnp.maximum(bc[i] - 1, 0))
        return bs[i] + kk

    grid_spec = pltpu.PrefetchScalarGridSpec(
        num_scalar_prefetch=2,
        grid=(n_tiles, max_bcount),
        in_specs=[
            pl.BlockSpec((1, tk), lambda i, k, bs, bc: (0, _eblk(i, k, bs, bc))),   # col
            pl.BlockSpec((tk, dp), lambda i, k, bs, bc: (_eblk(i, k, bs, bc), 0)),  # msg
            pl.BlockSpec((tm, dp), lambda i, k, bs, bc: (i, 0)),                    # h
            pl.BlockSpec((dp, hp), lambda i, k, bs, bc: (0, 0)),                    # W1'
            pl.BlockSpec((1, hp), lambda i, k, bs, bc: (0, 0)),                     # b1'
            pl.BlockSpec((hp, dp), lambda i, k, bs, bc: (0, 0)),                    # W2'
            pl.BlockSpec((1, dp), lambda i, k, bs, bc: (0, 0)),                     # b2'
            pl.BlockSpec(memory_space=pltpu.MemorySpace.SMEM),                      # eps
        ],
        out_specs=pl.BlockSpec((tm, dp), lambda i, k, bs, bc: (i, 0)),
        scratch_shapes=[pltpu.VMEM((tm, dp), jnp.float32)],
    )

    # VMEM budget: double-buffered streams + resident bf16 weights + f32 acc
    # + (tm, tk) one-hot/mask intermediates + finalize intermediates.
    est = (2 * (tk * dp * 2 + 8 * tk * 4 + tm * dp * 2 + tm * dp * 2)
           + 2 * (dp * hp * 2 + hp * dp * 2 + hp * 4 + dp * 4)
           + tm * dp * 4
           + tm * tk * 8
           + tm * hp * 4 + 2 * tm * dp * 4)
    vmem_limit = int(min(max(2 * est, 16 << 20), 48 << 20))   # fits v7x's 64 MiB with headroom

    kernel = functools.partial(gin_layer_kernel, apply_relu=apply_relu, tm=tm)
    return pl.pallas_call(
        kernel,
        out_shape=jax.ShapeDtypeStruct((n_pad, dp), jnp.bfloat16),
        grid_spec=grid_spec,
        compiler_params=pltpu.CompilerParams(
            dimension_semantics=("parallel", "arbitrary"),
            vmem_limit_bytes=vmem_limit),
    )(bstart, bcount, col2d, msg, h_pad, w1, b1, w2, b2, eps)


# ---------------------------------------------------------------------------
# Parameters: raw (torch-like) init, then offline BN folding + lane padding.
# ---------------------------------------------------------------------------
def init_params(key, emb_dim, num_layer):
    keys = iter(jax.random.split(key, 16 + 16 * num_layer))

    def dense(shape, scale=0.05):
        return (scale * jax.random.normal(next(keys), shape)).astype(jnp.float32)

    params = {
        "atom_emb": [dense((v, emb_dim)) for v in ATOM_FEATURE_DIMS],
        "layers": [],
    }
    for _ in range(num_layer):
        lp = {
            "bond_emb": [dense((v, emb_dim)) for v in BOND_FEATURE_DIMS],
            # GIN MLP: Linear(D,2D) -> BatchNorm1d(2D) -> ReLU -> Linear(2D,D)
            "w1": dense((emb_dim, 2 * emb_dim)),
            "b1": dense((2 * emb_dim,)),
            "g1": 1.0 + dense((2 * emb_dim,)),
            "be1": dense((2 * emb_dim,)),
            "m1": dense((2 * emb_dim,)),                 # running_mean
            "v1": 1.0 + jnp.abs(dense((2 * emb_dim,))),  # running_var (>0)
            "w2": dense((2 * emb_dim, emb_dim)),
            "b2": dense((emb_dim,)),
            # outer per-layer BatchNorm1d(emb_dim) of GNNNodeOGB
            "g2": 1.0 + dense((emb_dim,)),
            "be2": dense((emb_dim,)),
            "m2": dense((emb_dim,)),
            "v2": 1.0 + jnp.abs(dense((emb_dim,))),
            # torch.nn.Parameter(torch.Tensor([0]))
            "eps": jnp.zeros((1,), jnp.float32),
        }
        params["layers"].append(lp)
    return params


def prepare_params(params, emb_dim):
    """Fold eval-mode BatchNorm (running stats + affine) into the linears, pad to lanes."""
    dp = _round_up(emb_dim, LANE)
    hp = _round_up(2 * emb_dim, LANE)

    def fold(w, b, gamma, beta, mean, var):
        scale = gamma / jnp.sqrt(var + BN_EPS)
        return w * scale[None, :], (b - mean) * scale + beta

    def pad_cols(t):
        return jnp.pad(t, ((0, 0), (0, dp - emb_dim)))

    prepped = {
        "emb_dim": emb_dim,
        "atom_emb": [pad_cols(t) for t in params["atom_emb"]],
        "layers": [],
    }
    for lp in params["layers"]:
        w1, b1 = fold(lp["w1"], lp["b1"], lp["g1"], lp["be1"], lp["m1"], lp["v1"])
        w2, b2 = fold(lp["w2"], lp["b2"], lp["g2"], lp["be2"], lp["m2"], lp["v2"])
        prepped["layers"].append({
            "bond_emb": [pad_cols(t) for t in lp["bond_emb"]],
            "w1": jnp.pad(w1, ((0, dp - emb_dim), (0, hp - 2 * emb_dim))).astype(jnp.bfloat16),
            "b1": jnp.pad(b1.reshape(1, -1), ((0, 0), (0, hp - 2 * emb_dim))),
            "w2": jnp.pad(w2, ((0, hp - 2 * emb_dim), (0, dp - emb_dim))).astype(jnp.bfloat16),
            "b2": jnp.pad(b2.reshape(1, -1), ((0, 0), (0, dp - emb_dim))),
            "eps": lp["eps"].astype(jnp.float32),
        })
    return prepped


# ---------------------------------------------------------------------------
# Forward pass (GNNNodeOGB, gin, JK='last', residual=False, eval mode).
# ---------------------------------------------------------------------------
def gnn_node_ogb_forward(prepped, x, edge_index, edge_attr, num_layer, *, tm=None, tk=None):
    num_nodes = int(x.shape[0])
    num_edges = int(edge_index.shape[1])
    emb_dim = prepped["emb_dim"]
    dp = prepped["atom_emb"][0].shape[1]

    tm = tm if tm is not None else min(256, _round_up(num_nodes, SUBLANE))   # keep tm <= 256 (v5e roofline)
    tk = tk if tk is not None else min(2048, _round_up(num_edges, LANE))
    n_pad = _round_up(num_nodes, tm)
    e_pad = _round_up(num_edges, tk)
    n_tiles = n_pad // tm

    row, col = edge_index[0].astype(jnp.int32), edge_index[1].astype(jnp.int32)
    # Sort edges by target so each node tile touches a contiguous range of edge blocks.
    perm = jnp.argsort(col)
    row_s, col_s = row[perm], col[perm]
    col_p = jnp.concatenate(
        [col_s, jnp.full((e_pad - num_edges,), n_pad, jnp.int32)])   # pads never match a node
    col2d = col_p.reshape(1, e_pad)
    edge_attr_s = edge_attr[perm]

    # Per-node-tile edge-block ranges (scalar-prefetch tables) + static max block count.
    starts = (jnp.arange(n_tiles) * tm).astype(jnp.int32)
    lo = jnp.searchsorted(col_p, starts, side="left")
    hi = jnp.searchsorted(col_p, starts + tm, side="left")
    has = hi > lo
    bstart = jnp.where(has, lo // tk, 0).astype(jnp.int32)
    bcount = jnp.where(has, (hi - 1) // tk - lo // tk + 1, 0).astype(jnp.int32)
    # Wrapper runs eagerly -> static grid extent; total steps ~ E/tk + N/tm instead of N*E/(tm*tk).
    max_bcount = max(int(jnp.max(bcount)), 1)

    # AtomEncoder: sum of per-feature embedding lookups (gather kept in JAX).
    h = jnp.zeros((num_nodes, dp), jnp.float32)
    for f, tab in enumerate(prepped["atom_emb"]):
        h = h + jnp.take(tab, x[:, f], axis=0)
    h = jnp.pad(h, ((0, n_pad - num_nodes), (0, 0))).astype(jnp.bfloat16)   # h lives in bf16

    for layer in range(num_layer):
        lp = prepped["layers"][layer]
        # BondEncoder sum, x_j = h[row] gather and the message ReLU are fused here into a
        # single bf16 (E_pad, dp) stream so the kernel reads one edge stream per step.
        # TODO(synk): move these gathers fully into the kernel (VMEM-resident h + bond
        # tables, scalar-prefetched indices) once in-kernel dynamic row-gather is reliable.
        e_emb = jnp.zeros((num_edges, dp), jnp.float32)
        for f, tab in enumerate(lp["bond_emb"]):
            e_emb = e_emb + jnp.take(tab, edge_attr_s[:, f], axis=0)
        x_j = jnp.take(h, row_s, axis=0).astype(jnp.float32)
        msg = jnp.maximum(x_j + e_emb, 0.0).astype(jnp.bfloat16)
        msg = jnp.pad(msg, ((0, e_pad - num_edges), (0, 0)))
        apply_relu = layer != num_layer - 1        # last layer: dropout only (no relu)
        h = gin_layer(col2d, msg, h,
                      lp["w1"], lp["b1"], lp["w2"], lp["b2"], lp["eps"],
                      bstart, bcount, max_bcount, tm=tm, tk=tk, apply_relu=apply_relu)
        # dropout(p=drop_ratio) is identity in eval mode

    return h[:num_nodes, :emb_dim].astype(jnp.float32)     # JK == 'last'


# ---------------------------------------------------------------------------
# Pure-JAX f32 reference (matches the PyTorch module in eval mode).
# ---------------------------------------------------------------------------
def reference_forward(params, x, edge_index, edge_attr, num_layer):
    num_nodes = x.shape[0]
    emb_dim = params["atom_emb"][0].shape[1]
    h = jnp.zeros((num_nodes, emb_dim), jnp.float32)
    for f, tab in enumerate(params["atom_emb"]):
        h = h + jnp.take(tab, x[:, f], axis=0)
    row, col = edge_index[0], edge_index[1]
    for layer in range(num_layer):
        lp = params["layers"][layer]
        e_emb = jnp.zeros((edge_attr.shape[0], emb_dim), jnp.float32)
        for f, tab in enumerate(lp["bond_emb"]):
            e_emb = e_emb + jnp.take(tab, edge_attr[:, f], axis=0)
        msg = jnp.maximum(h[row] + e_emb, 0.0)
        agg = jnp.zeros_like(h).at[col].add(msg)
        z = (1.0 + lp["eps"][0]) * h + agg
        t = z @ lp["w1"] + lp["b1"]
        t = (t - lp["m1"]) / jnp.sqrt(lp["v1"] + BN_EPS) * lp["g1"] + lp["be1"]
        t = jnp.maximum(t, 0.0)
        o = t @ lp["w2"] + lp["b2"]
        o = (o - lp["m2"]) / jnp.sqrt(lp["v2"] + BN_EPS) * lp["g2"] + lp["be2"]
        if layer != num_layer - 1:
            o = jnp.maximum(o, 0.0)
        h = o
    return h


if __name__ == "__main__":
    NUM_NODES = 24
    NUM_EDGES = 300
    EMB_DIM = 128
    NUM_LAYER = 2

    key = jax.random.PRNGKey(0)
    k_params, k_x, k_src, k_dst, k_ea = jax.random.split(key, 5)

    params = init_params(k_params, EMB_DIM, NUM_LAYER)
    prepped = prepare_params(params, EMB_DIM)

    # Categorical atom features (N, 9) and bond features (E, 3)
    x = jnp.stack(
        [jax.random.randint(jax.random.fold_in(k_x, i), (NUM_NODES,), 0, v)
         for i, v in enumerate(ATOM_FEATURE_DIMS)], axis=1).astype(jnp.int32)
    edge_index = jnp.stack([
        jax.random.randint(k_src, (NUM_EDGES,), 0, NUM_NODES),
        jax.random.randint(k_dst, (NUM_EDGES,), 0, NUM_NODES),
    ], axis=0).astype(jnp.int32)
    edge_attr = jnp.stack(
        [jax.random.randint(jax.random.fold_in(k_ea, i), (NUM_EDGES,), 0, v)
         for i, v in enumerate(BOND_FEATURE_DIMS)], axis=1).astype(jnp.int32)

    # Small tiles so the demo exercises the node-tile x edge-block grid and block skipping.
    out = gnn_node_ogb_forward(prepped, x, edge_index, edge_attr, NUM_LAYER, tm=8, tk=128)
    jax.block_until_ready(out)
    assert out.shape == (NUM_NODES, EMB_DIM)

    ref = reference_forward(params, x, edge_index, edge_attr, NUM_LAYER)
    rel_err = float(jnp.max(jnp.abs(out - ref)) / (jnp.max(jnp.abs(ref)) + 1e-6))
    assert rel_err < 5e-2, f"relative error vs f32 reference too large: {rel_err}"
    print("KERNEL_OK")
</pallas_src>

<mosaic_0001>
module attributes {stable_mosaic.version = 11 : i64} {
  func.func @gin_layer_kernel(%arg0: i32, %arg1: i32, %arg2: memref<3xi32, #tpu.memory_space<smem>>, %arg3: memref<3xi32, #tpu.memory_space<smem>>, %arg4: memref<1x128xi32, #tpu.memory_space<vmem>>, %arg5: memref<128x128xbf16, #tpu.memory_space<vmem>>, %arg6: memref<8x128xbf16, #tpu.memory_space<vmem>>, %arg7: memref<128x256xbf16, #tpu.memory_space<vmem>>, %arg8: memref<1x256xf32, #tpu.memory_space<vmem>>, %arg9: memref<256x128xbf16, #tpu.memory_space<vmem>>, %arg10: memref<1x128xf32, #tpu.memory_space<vmem>>, %arg11: memref<1xf32, #tpu.memory_space<smem>>, %arg12: memref<8x128xbf16, #tpu.memory_space<vmem>>, %arg13: memref<8x128xf32, #tpu.memory_space<vmem>>) attributes {dimension_semantics = [#tpu.dimension_semantics<parallel>, #tpu.dimension_semantics<arbitrary>], iteration_bounds = array<i64: 3, 2>, scalar_prefetch = 2 : i64, scratch_operands = 1 : i64, tpu.core_type = #tpu.core_type<tc>, window_params = [{transform_indices = @transform_0, window_bounds = array<i64: 1, 128>}, {transform_indices = @transform_1, window_bounds = array<i64: 128, 128>}, {transform_indices = @transform_2, window_bounds = array<i64: 8, 128>}, {pipeline_mode = #tpu.pipeline_mode<synchronous>, transform_indices = @transform_3, window_bounds = array<i64: 128, 256>}, {pipeline_mode = #tpu.pipeline_mode<synchronous>, transform_indices = @transform_4, window_bounds = array<i64: 1, 256>}, {pipeline_mode = #tpu.pipeline_mode<synchronous>, transform_indices = @transform_5, window_bounds = array<i64: 256, 128>}, {pipeline_mode = #tpu.pipeline_mode<synchronous>, transform_indices = @transform_6, window_bounds = array<i64: 1, 128>}, {transform_indices = @transform_7, window_bounds = array<i64: 1>}, {transform_indices = @transform_8, window_bounds = array<i64: 8, 128>}]} {
    %c0_i32 = arith.constant 0 : i32
    %0 = arith.cmpi eq, %arg1, %c0_i32 : i32
    %1 = arith.extui %0 : i1 to i32
    %c0_i32_0 = arith.constant 0 : i32
    %2 = arith.cmpi ne, %1, %c0_i32_0 : i32
    scf.if %2 {
      %cst = arith.constant 0.000000e+00 : f32
      %11 = vector.broadcast %cst : f32 to vector<8x128xf32>
      %c0 = arith.constant 0 : index
      %c0_3 = arith.constant 0 : index
      %12 = vector.load %arg13[%c0, %c0_3] : memref<8x128xf32, #tpu.memory_space<vmem>>, vector<8x128xf32>
      tpu.vector_store %arg13[%c0, %c0_3], %11 {strides = array<i32>} : memref<8x128xf32, #tpu.memory_space<vmem>>, vector<8x128xf32>,
    } else {
    }
    %3 = arith.index_cast %arg0 : i32 to index
    %4 = memref.load %arg3[%3] : memref<3xi32, #tpu.memory_space<smem>>
    %5 = arith.cmpi slt, %arg1, %4 : i32
    %6 = arith.extui %5 : i1 to i32
    %c0_i32_1 = arith.constant 0 : i32
    %7 = arith.cmpi ne, %6, %c0_i32_1 : i32
    scf.if %7 {
      %c0 = arith.constant 0 : index
      %c0_3 = arith.constant 0 : index
      %11 = vector.load %arg4[%c0, %c0_3] : memref<1x128xi32, #tpu.memory_space<vmem>>, vector<1x128xi32>
      %c8_i32 = arith.constant 8 : i32
      %12 = arith.muli %arg0, %c8_i32 : i32
      %13 = vector.broadcast %12 : i32 to vector<1x128xi32>
      %14 = arith.subi %11, %13 : vector<1x128xi32>
      %15 = tpu.iota {dimensions = array<i32: 0>} : vector<8x1xi32>
      %16 = vector.broadcast %15 : vector<8x1xi32> to vector<8x128xi32>
      %17 = vector.broadcast %14 : vector<1x128xi32> to vector<8x128xi32>
      %18 = arith.cmpi eq, %16, %17 : vector<8x128xi32>
      %19 = arith.extui %18 : vector<8x128xi1> to vector<8x128xi32>
      %20 = arith.sitofp %19 : vector<8x128xi32> to vector<8x128xf32>
      %21 = arith.truncf %20 : vector<8x128xf32> to vector<8x128xbf16>
      %c0_4 = arith.constant 0 : index
      %c0_5 = arith.constant 0 : index
      %22 = vector.load %arg13[%c0_4, %c0_5] : memref<8x128xf32, #tpu.memory_space<vmem>>, vector<8x128xf32>
      %c0_6 = arith.constant 0 : index
      %c0_7 = arith.constant 0 : index
      %23 = vector.load %arg5[%c0_6, %c0_7] : memref<128x128xbf16, #tpu.memory_space<vmem>>, vector<128x128xbf16>
      %cst = arith.constant dense<0.000000e+00> : vector<8x128xf32>
      %24 = tpu.matmul %21, %23, %cst {dimension_numbers = #tpu.dot_dimension_numbers<[1], [0], [0], [1], [0, 0, 1, 1], [], []>} : vector<8x128xbf16>, vector<128x128xbf16>, vector<8x128xf32> -> vector<8x128xf32>
      %25 = arith.addf %22, %24 : vector<8x128xf32>
      %c0_8 = arith.constant 0 : index
      %c0_9 = arith.constant 0 : index
      %26 = vector.load %arg13[%c0_8, %c0_9] : memref<8x128xf32, #tpu.memory_space<vmem>>, vector<8x128xf32>
      tpu.vector_store %arg13[%c0_8, %c0_9], %25 {strides = array<i32>} : memref<8x128xf32, #tpu.memory_space<vmem>>, vector<8x128xf32>,
    } else {
    }
    %c1_i32 = arith.constant 1 : i32
    %8 = arith.cmpi eq, %arg1, %c1_i32 : i32
    %9 = arith.extui %8 : i1 to i32
    %c0_i32_2 = arith.constant 0 : i32
    %10 = arith.cmpi ne, %9, %c0_i32_2 : i32
    scf.if %10 {
      %c0 = arith.constant 0 : index
      %11 = memref.load %arg11[%c0] : memref<1xf32, #tpu.memory_space<smem>>
      %cst = arith.constant 1.000000e+00 : f32
      %12 = arith.addf %cst, %11 : f32
      %c0_3 = arith.constant 0 : index
      %c0_4 = arith.constant 0 : index
      %13 = vector.load %arg6[%c0_3, %c0_4] : memref<8x128xbf16, #tpu.memory_space<vmem>>, vector<8x128xbf16>
      %14 = arith.extf %13 : vector<8x128xbf16> to vector<8x128xf32>
      %15 = vector.broadcast %12 : f32 to vector<8x128xf32>
      %16 = arith.mulf %15, %14 : vector<8x128xf32>
      %c0_5 = arith.constant 0 : index
      %c0_6 = arith.constant 0 : index
      %17 = vector.load %arg13[%c0_5, %c0_6] : memref<8x128xf32, #tpu.memory_space<vmem>>, vector<8x128xf32>
      %18 = arith.addf %16, %17 : vector<8x128xf32>
      %19 = arith.truncf %18 : vector<8x128xf32> to vector<8x128xbf16>
      %c0_7 = arith.constant 0 : index
      %c0_8 = arith.constant 0 : index
      %20 = vector.load %arg7[%c0_7, %c0_8] : memref<128x256xbf16, #tpu.memory_space<vmem>>, vector<128x256xbf16>
      %cst_9 = arith.constant dense<0.000000e+00> : vector<8x256xf32>
      %21 = tpu.matmul %19, %20, %cst_9 {dimension_numbers = #tpu.dot_dimension_numbers<[1], [0], [0], [1], [0, 0, 1, 1], [], []>} : vector<8x128xbf16>, vector<128x256xbf16>, vector<8x256xf32> -> vector<8x256xf32>
      %c0_10 = arith.constant 0 : index
      %c0_11 = arith.constant 0 : index
      %22 = vector.load %arg8[%c0_10, %c0_11] : memref<1x256xf32, #tpu.memory_space<vmem>>, vector<1x256xf32>
      %23 = vector.broadcast %22 : vector<1x256xf32> to vector<8x256xf32>
      %24 = arith.addf %21, %23 : vector<8x256xf32>
      %cst_12 = arith.constant 0.000000e+00 : f32
      %25 = vector.broadcast %cst_12 : f32 to vector<8x256xf32>
      %26 = arith.maximumf %24, %25 : vector<8x256xf32>
      %27 = arith.truncf %26 : vector<8x256xf32> to vector<8x256xbf16>
      %c0_13 = arith.constant 0 : index
      %c0_14 = arith.constant 0 : index
      %28 = vector.load %arg9[%c0_13, %c0_14] : memref<256x128xbf16, #tpu.memory_space<vmem>>, vector<256x128xbf16>
      %cst_15 = arith.constant dense<0.000000e+00> : vector<8x128xf32>
      %29 = tpu.matmul %27, %28, %cst_15 {dimension_numbers = #tpu.dot_dimension_numbers<[1], [0], [0], [1], [0, 0, 1, 1], [], []>} : vector<8x256xbf16>, vector<256x128xbf16>, vector<8x128xf32> -> vector<8x128xf32>
      %c0_16 = arith.constant 0 : index
      %c0_17 = arith.constant 0 : index
      %30 = vector.load %arg10[%c0_16, %c0_17] : memref<1x128xf32, #tpu.memory_space<vmem>>, vector<1x128xf32>
      %31 = vector.broadcast %30 : vector<1x128xf32> to vector<8x128xf32>
      %32 = arith.addf %29, %31 : vector<8x128xf32>
      %cst_18 = arith.constant 0.000000e+00 : f32
      %33 = vector.broadcast %cst_18 : f32 to vector<8x128xf32>
      %34 = arith.maximumf %32, %33 : vector<8x128xf32>
      %35 = arith.truncf %34 : vector<8x128xf32> to vector<8x128xbf16>
      %c0_19 = arith.constant 0 : index
      %c0_20 = arith.constant 0 : index
      %36 = vector.load %arg12[%c0_19, %c0_20] : memref<8x128xbf16, #tpu.memory_space<vmem>>, vector<8x128xbf16>
      tpu.vector_store %arg12[%c0_19, %c0_20], %35 {strides = array<i32>} : memref<8x128xbf16, #tpu.memory_space<vmem>>, vector<8x128xbf16>,
    } else {
    }
    return
  }
  func.func @transform_0(%arg0: i32, %arg1: i32, %arg2: memref<3xi32, #tpu.memory_space<smem>>, %arg3: memref<3xi32, #tpu.memory_space<smem>>) -> (i32, i32) {
    %0 = arith.index_cast %arg0 : i32 to index
    %1 = memref.load %arg3[%0] : memref<3xi32, #tpu.memory_space<smem>>
    %c1_i32 = arith.constant 1 : i32
    %2 = arith.subi %1, %c1_i32 : i32
    %c0_i32 = arith.constant 0 : i32
    %3 = arith.maxsi %2, %c0_i32 : i32
    %4 = arith.minsi %arg1, %3 : i32
    %5 = arith.index_cast %arg0 : i32 to index
    %6 = memref.load %arg2[%5] : memref<3xi32, #tpu.memory_space<smem>>
    %7 = arith.addi %6, %4 : i32
    %c0_i32_0 = arith.constant 0 : i32
    %c0_i32_1 = arith.constant 0 : i32
    return %c0_i32_0, %7 : i32, i32
  }
  func.func @transform_1(%arg0: i32, %arg1: i32, %arg2: memref<3xi32, #tpu.memory_space<smem>>, %arg3: memref<3xi32, #tpu.memory_space<smem>>) -> (i32, i32) {
    %0 = arith.index_cast %arg0 : i32 to index
    %1 = memref.load %arg3[%0] : memref<3xi32, #tpu.memory_space<smem>>
    %c1_i32 = arith.constant 1 : i32
    %2 = arith.subi %1, %c1_i32 : i32
    %c0_i32 = arith.constant 0 : i32
    %3 = arith.maxsi %2, %c0_i32 : i32
    %4 = arith.minsi %arg1, %3 : i32
    %5 = arith.index_cast %arg0 : i32 to index
    %6 = memref.load %arg2[%5] : memref<3xi32, #tpu.memory_space<smem>>
    %7 = arith.addi %6, %4 : i32
    %c0_i32_0 = arith.constant 0 : i32
    %c0_i32_1 = arith.constant 0 : i32
    return %7, %c0_i32_0 : i32, i32
  }
  func.func @transform_2(%arg0: i32, %arg1: i32, %arg2: memref<3xi32, #tpu.memory_space<smem>>, %arg3: memref<3xi32, #tpu.memory_space<smem>>) -> (i32, i32) {
    %c0_i32 = arith.constant 0 : i32
    %c0_i32_0 = arith.constant 0 : i32
    return %arg0, %c0_i32 : i32, i32
  }
  func.func @transform_3(%arg0: i32, %arg1: i32, %arg2: memref<3xi32, #tpu.memory_space<smem>>, %arg3: memref<3xi32, #tpu.memory_space<smem>>) -> (i32, i32) {
    %c0_i32 = arith.constant 0 : i32
    %c0_i32_0 = arith.constant 0 : i32
    %c0_i32_1 = arith.constant 0 : i32
    return %c0_i32, %c0_i32_0 : i32, i32
  }
  func.func @transform_4(%arg0: i32, %arg1: i32, %arg2: memref<3xi32, #tpu.memory_space<smem>>, %arg3: memref<3xi32, #tpu.memory_space<smem>>) -> (i32, i32) {
    %c0_i32 = arith.constant 0 : i32
    %c0_i32_0 = arith.constant 0 : i32
    %c0_i32_1 = arith.constant 0 : i32
    return %c0_i32, %c0_i32_0 : i32, i32
  }
  func.func @transform_5(%arg0: i32, %arg1: i32, %arg2: memref<3xi32, #tpu.memory_space<smem>>, %arg3: memref<3xi32, #tpu.memory_space<smem>>) -> (i32, i32) {
    %c0_i32 = arith.constant 0 : i32
    %c0_i32_0 = arith.constant 0 : i32
    %c0_i32_1 = arith.constant 0 : i32
    return %c0_i32, %c0_i32_0 : i32, i32
  }
  func.func @transform_6(%arg0: i32, %arg1: i32, %arg2: memref<3xi32, #tpu.memory_space<smem>>, %arg3: memref<3xi32, #tpu.memory_space<smem>>) -> (i32, i32) {
    %c0_i32 = arith.constant 0 : i32
    %c0_i32_0 = arith.constant 0 : i32
    %c0_i32_1 = arith.constant 0 : i32
    return %c0_i32, %c0_i32_0 : i32, i32
  }
  func.func @transform_7(%arg0: i32, %arg1: i32, %arg2: memref<3xi32, #tpu.memory_space<smem>>, %arg3: memref<3xi32, #tpu.memory_space<smem>>) -> i32 {
    %c0_i32 = arith.constant 0 : i32
    %c0_i32_0 = arith.constant 0 : i32
    return %c0_i32 : i32
  }
  func.func @transform_8(%arg0: i32, %arg1: i32, %arg2: memref<3xi32, #tpu.memory_space<smem>>, %arg3: memref<3xi32, #tpu.memory_space<smem>>) -> (i32, i32) {
    %c0_i32 = arith.constant 0 : i32
    %c0_i32_0 = arith.constant 0 : i32
    return %arg0, %c0_i32 : i32, i32
  }
}

</mosaic_0001>

<bundles_post_ra>
// kernel: tpu_custom_call.1
= control target key start
LH: loop header
LB: loop body
LE: loop exit
PB: predicated region body
PF: predicated region fallthrough
CT: control target
= control target key end

     0   :  { %s1747_s19 = smov [#allocation4]   ;;  %s1748_s20 = smov [#allocation5]   ;;  %s2157_s0 = inlined_call_operand.hbm [shape: s32[3], index: 0, kind: input, shape index: {}]   ;;  %s2158_s2 = inlined_call_operand.vmem [shape: s32[1,384], index: 2, kind: input, shape index: {}]   ;;  %s2159_s3 = inlined_call_operand.hbm [shape: bf16[384,128], index: 3, kind: input, shape index: {}]   ;;  %s2160_s4 = inlined_call_operand.hbm [shape: bf16[24,128], index: 4, kind: input, shape index: {}]   ;;  %s2161_s5 = inlined_call_operand.hbm [shape: bf16[128,256], index: 5, kind: input, shape index: {}]   ;;  %s2162_s6 = inlined_call_operand.vmem [shape: f32[1,256], index: 6, kind: input, shape index: {}]   ;;  %s2163_s7 = inlined_call_operand.hbm [shape: bf16[256,128], index: 7, kind: input, shape index: {}]   ;;  %s2164_s8 = inlined_call_operand.vmem [shape: f32[1,128], index: 8, kind: input, shape index: {}]   ;;  %s2165_s10 = inlined_call_operand.hbm [shape: bf16[24,128], index: 10, kind: output, shape index: {}]   ;;  %s2166_s1 = inlined_call_operand.hbm [shape: s32[3], index: 1, kind: input, shape index: {}]   ;;  %s2167_s9 = inlined_call_operand.<no memory space> [shape: f32[1], index: 9, kind: input, shape index: {}]  }
   0x1   :  { %2181 = sst [smem:[#allocation31_spill]] %s2158_s2  ;;  %s16_s15 = sshll.u32 %s2157_s0, 4  ;;  %s17_s15 = int_to_ptr.hbm [resolvable:$true] %s16_s15 }
   0x2   :  { %2182 = sst [smem:[#allocation32_spill]] %s2159_s3  ;;  %s21_s18 = sshll.u32 %s2166_s1, 4  ;;  %s22_s18 = int_to_ptr.hbm [resolvable:$true] %s21_s18 }
   0x3   :  { %2183 = sst [smem:[#allocation33_spill]] %s2161_s5 }
   0x4   :  { %2184 = sst [smem:[#allocation34_spill]] %s2162_s6 }
   0x5   :  { %2185 = sst [smem:[#allocation35_spill]] %s2163_s7 }
   0x6   :  { %2186 = sst [smem:[#allocation36_spill]] %s2164_s8 }
   0x7   :  { %2187 = sst [smem:[#allocation37_spill]] %s2165_s10 }
   0x8   :  { %19 = dma.hbm_to_smem %s17_s15, 16, %s1747_s19, [#allocation3] }
   0x9   :  { %24 = dma.hbm_to_smem %s22_s18, 16, %s1748_s20, [#allocation3] }
   0xa   :  { %25 = sst [smem:[#allocation6]] %s2167_s9 }
   0xb   :  { %1681 = dma.done.wait [#allocation3], 32 }
   0xc   :  { %1682 = vsyncadd [#allocation3], 4294967264 }
   0xd   :  { %28 = sfence }
   0xe   :  { %29 = vsyncpa [#allocation8], 0 }
   0xf   :  { %31 = vsyncpa [#allocation8 + $0x1], 0 }
  0x10   :  { %32 = vsyncpa [#allocation11], 0 }
  0x11   :  { %34 = vsyncpa [#allocation11 + $0x1], 0 }
  0x12   :  { %35 = vsyncpa [#allocation14], 0 }
  0x13   :  { %36 = vsyncpa [#allocation9], 0 }
  0x14   :  { %38 = vsyncpa [#allocation9 + $0x1], 0  ;;  %s1821_s0 = smov 0   ;;  %s1823_s1 = smov 0  }
  0x15   :  { %s1825_s23 = smov 0   ;;  %s1827_s24 = smov 0  }
  0x16   :  { %s1829_s25 = smov 0   ;;  %s1831_s9 = smov 0  }
  0x17   :  { %s1833_s26 = smov 0   ;;  %s1835_s27 = smov 0  }
  0x18   :  { %s1837_s28 = smov 0   ;;  %s1839_s29 = smov 0  }
  0x19   :  { %s1841_s30 = smov 0  }
  0x1a LB: > { %2188 = sst [smem:[#allocation26_spill]] %s1729_s26  ;;  %s1877_s11 = sadd.s32 4294967295, %s1745_s30   ;;  %s1745_s30 = sphi %s1841_s30, %s44_s30   ;;  %s1741_s29 = sphi %s1839_s29, %s2238_s29   ;;  %s1737_s28 = sphi %s1837_s28, %s2237_s28   ;;  %s1733_s27 = sphi %s1835_s27, %s2236_s27   ;;  %s1729_s26 = sphi %s1833_s26, %s2235_s26   ;;  %s1725_s9 = sphi %s1831_s9, %s2234_s9   ;;  %s1721_s25 = sphi %s1829_s25, %s2233_s25   ;;  %s1717_s24 = sphi %s1827_s24, %s2232_s24   ;;  %s1713_s23 = sphi %s1825_s23, %s2231_s23   ;;  %s1709_s1 = sphi %s1823_s1, %s2230_s1   ;;  %s1705_s0 = sphi %s1821_s0, %s2229_s0  }
  0x1b   : > { %2189 = sst [smem:[#allocation27_spill]] %s1733_s27  ;;  %p1091_p0 = scmp.ge.s32.totalorder %s1745_s30, 1 }
  0x1c   : > { %p2175_p1 = scmp.eq.s32.totalorder %s1877_s11, 0  ;;  %p302_p2 = scmp.lt.s32.totalorder %s1745_s30, 7 }
  0x1d   : > { %s2190_s5 = sld [smem:[#allocation33_spill]]  ;;  %s1749_s16 = smov [#allocation12]  }
  0x1e   : > { %p1885_p3 = pnand %p1091_p0, %p302_p2  ;;  %s315_s17 = sshll.u32 %s1749_s16, 4  ;;  %s316_s17 = int_to_ptr.vmem [resolvable:$true] %s315_s17 }
  0x1f   : > { %s2192_s7 = sld [smem:[#allocation35_spill]]  ;;  %s1750_s21 = smov 128  }
  0x20   : > { %p1338_p4 = pneg %p1885_p3  ;;  %s1751_s22 = smov 8  }
  0x21   : > { %s1752_s12 = smov [#allocation13]   ;;  %s2168_s16 = smov 64  }
  0x22   : > { %p1339_p5 = pnand %p1338_p4, %p2175_p1  ;;  %s332_s13 = sshll.u32 %s1752_s12, 4  ;;  %s333_s13 = int_to_ptr.vmem [resolvable:$true] %s332_s13 }
  0x23   : > { %s313_s14 = sshll.u32 %s2190_s5, 4  ;;  %s2169_s5 = smov 4   ;;  %s314_s14 = int_to_ptr.hbm [resolvable:$true] %s313_s14 }
  0x24   : > { %1341 = dma.hbm_to_vmem [thread:$0]  (!%p1339_p5), %s314_s14, 2048, %s316_s17, [#allocation11], %s1750_s21, %s1750_s21, %s1751_s22  }
  0x25   : > { %s330_s20 = sshll.u32 %s2192_s7, 4  ;;  %s53_s18 = sadd.s32 1, %s1737_s28  ;;  %s331_s20 = int_to_ptr.hbm [resolvable:$true] %s330_s20 }
  0x26   : > { %1344 = dma.hbm_to_vmem [thread:$0]  (!%p1339_p5), %s331_s20, 2048, %s333_s13, [#allocation14], %s2168_s16, %s2168_s16, %s2169_s5  }
  0x27   : > { %s56_s19 = sadd.s32 1, %s1741_s29  ;;  %p54_p6 = scmp.ge.s32.totalorder %s53_s18, 2 }
  0x28   : > { %s102_s7 = sld [smem:[#allocation5 + %s1741_s29]]  ;;  %p128_p7 = scmp.ne.s32.totalorder %s1725_s9, %s1721_s25 }
  0x29   : > { %s1903_s14 = sld [smem:[#allocation4 + %s1741_s29]]  ;;  %s2240_s18 = smov (%p54_p6, %s53_s18), 0 }
  0x2a   : > { %2193 = sst [smem:[#allocation28_spill]] %s2240_s18  ;;  %s2242_s19 = smov (!%p54_p6, %s56_s19), %s1741_s29 }
  0x2b   : > { %p2178_p8 = scmp.eq.s32.totalorder %s1745_s30, 0  ;;  %p58_p9 = scmp.ge.s32.totalorder %s2242_s19, 3 }
  0x2c   : > { %p134_p10 = scmp.ne.s32.totalorder %s1721_s25, %s1717_s24  ;;  %p2176_p0 = scmp.lt.s32.totalorder %s1745_s30, 6 }
  0x2d   : > { %s2244_s19 = smov (%p58_p9, %s2242_s19), 0  ;;  %p1925_p13 = por %p2178_p8, %p128_p7 }
  0x2e   : > { %s1089_s17 = sadd.s32 4294967295, %s102_s7  ;;  %2194 = sst [smem:[#allocation29_spill]] %s2244_s19 }
  0x2f   : > { %p104_p11 = scmp.gt.s32.totalorder %s1089_s17, 0  ;;  %p1918_p12 = por %p2175_p1, %p134_p10 }
  0x30   : > { %s110_s22 = sld [smem:[#allocation5 + %s2244_s19]]  ;;  %s2171_s7 = sand.u32 1, %s1725_s9  }
  0x31   : > { %s2246_s17 = smov (!%p104_p11, %s1089_s17), 0  ;;  %s116_s12 = sld [smem:[#allocation4 + %s2244_s19]] }
  0x32   : > { %p106_p2 = scmp.lt.s32.totalorder %s1737_s28, %s2246_s17  ;;  %s1095_s13 = sshll.u32 %s2171_s7, 6 }
  0x33   : > { %p1940_p4 = pnand %p2176_p0, %p1925_p13  ;;  %s378_s7 = scalar_lea.vmem [#allocation7], %s1095_s13 }
  0x34   : > { %s107_s16 = scalar_select %p106_p2, %s1737_s28, %s2246_s17 }
  0x35   : > { %s1324_s10 = scalar_select %p1925_p13, [#allocation5], [#allocation16] }
  0x36   : > { %s1090_s5 = sadd.s32 4294967295, %s110_s22  ;;  %s109_s6 = sadd.s32 %s1903_s14, %s107_s16 }
  0x37   : > { %p112_p5 = scmp.gt.s32.totalorder %s1090_s5, 0  ;;  %s2250_s10 = smov (!%p2176_p0, %s1324_s10), [#allocation18] }
  0x38   : > { %s1325_s8 = scalar_select %p1925_p13, %s1741_s29, 0 }
  0x39   : > { %s2248_s5 = smov (!%p112_p5, %s1090_s5), 0  ;;  %s1956_s2 = sshll.u32 %s378_s7, 4 }
  0x3a   : > { %p114_p6 = scmp.lt.s32.totalorder %s2240_s18, %s2248_s5  ;;  %s2252_s8 = smov (!%p2176_p0, %s1325_s8), 0 }
  0x3b   : > { %2198 = sst [smem:[#allocation30_spill]] %s1956_s2  ;;  %s1086_s13 = sadd.s32 4294967294, %s1745_s30  }
  0x3c   : > { %s115_s17 = scalar_select %p114_p6, %s2240_s18, %s2248_s5 }
  0x3d   : > { %s379_s27 = sld [smem:[%s2250_s10 + %s2252_s8]]  ;;  %s2199_s5 = sadd.s32 1, %s1725_s9 }
  0x3e   : > { %s117_s22 = sadd.s32 %s116_s12, %s115_s17  ;;  %s147_s10 = sadd.s32 1, %s1713_s23 }
  0x3f   : > { %s118_s26 = ssub.s32 %s109_s6, %s117_s22  ;;  %s144_s6 = ssub.s32 %s1741_s29, %s2244_s19 }
  0x40   : > { %p119_p7 = scmp.eq.s32.totalorder %s118_s26, 0  ;;  %p145_p11 = scmp.eq.s32.totalorder %s144_s6, 0 }
  0x41   : > { %s1326_s16 = scalar_select %p1925_p13, [#allocation4], [#allocation17] }
  0x42   : > { %s1963_s14 = scalar_select %p119_p7, %s1725_s9, %s2199_s5  }
  0x43   : > { %s2254_s16 = smov (!%p2176_p0, %s1326_s16), [#allocation19]  ;;  %s1096_s12 = sadd.s32 4294967295, %s379_s27 }
  0x44   : > { %s385_s7 = sld [smem:[%s2254_s16 + %s2252_s8]]  ;;  %p381_p9 = scmp.gt.s32.totalorder %s1096_s12, 0 }
  0x45   : > { %s1974_s24 = scalar_select %p145_p11, %s1713_s23, %s147_s10  }
  0x46   : > { %s2256_s12 = smov (!%p381_p9, %s1096_s12), 0  ;;  %p2177_p13 = scmp.ne.s32.totalorder %s1709_s1, %s1705_s0 }
  0x47   : > { %p383_p10 = scmp.lt.s32.totalorder %s1737_s28, %s2256_s12  ;;  %s2200_s3 = sld [smem:[#allocation32_spill]] }
  0x48   : > { %p154_p2 = scmp.ne.s32.totalorder %s1713_s23, %s1709_s1  ;;  %p1989_p5 = por %p2177_p13, %p2175_p1 }
  0x49   : > { %s384_s26 = scalar_select %p383_p10, %s1737_s28, %s2256_s12 }
  0x4a   : > { %p289_p6 = scmp.eq.s32.totalorder %s1877_s11, 5  ;;  %s2202_s12 = sand.u32 1, %s1725_s9  }
  0x4b   : > { %s386_s27 = sadd.s32 %s385_s7, %s384_s26  ;;  %s375_s6 = scalar_lea.sflag [#allocation8], %s2202_s12 }
  0x4c   : > { %s1279_s17 = sshll.u32 %s386_s27, 6  ;;  %p1553_p9 = pneg %p1940_p4 }
  0x4d   : > { %s391_s16 = scalar_lea.hbm %s2200_s3, %s1279_s17  ;;  %s1556_s17 = scalar_lea.hbm %s2200_s3, 192 }
  0x4e   : > { %s392_s5 = sshll.u32 %s391_s16, 4  ;;  %s393_s5 = int_to_ptr.hbm [resolvable:$true] %s392_s5 }
  0x4f   : > { %s1549_s7 = sshra.s32 %s393_s5, 4  ;;  %s1550_s7 = int_to_ptr.hbm [resolvable:$true] %s1549_s7 }
  0x50   : > { %s1551_s10 = scalar_lea.hbm %s1550_s7, 64  ;;  %p1557_p1 = scmp.lt.s32.totalorder %s1550_s7, %s2200_s3 }
  0x51   : > { %p1552_p7 = scmp.ne.s32.totalorder %s1550_s7, %s1551_s10  ;;  %p1558_p0 = scmp.lt.s32.totalorder %s1556_s17, %s1551_s10 }
  0x53   : > { %p1554_p10 = pnand %p1553_p9, %p1552_p7  ;;  %p1559_p13 = por %p1558_p0, %p1557_p1 }
  0x55   : > { %p1555_p11 = pneg %p1554_p10 }
  0x57   : > { %p1560_p8 = pnand %p1559_p13, %p1555_p11 }
  0x59   : > { %1563 = shalt.err (!%p1560_p8)
}
  0x5a   : > { %s2203_s16 = smov 4   ;;  %s2204_s12 = smov 64  }
  0x5b   : > { %s2205_s19 = sld [smem:[#allocation30_spill]]  ;;  %p2016_p1 = por %p289_p6, %p154_p2 }
  0x5c   : > { %p295_p8 = scmp.eq.s32.totalorder %s1086_s13, 5  ;;  %p2208_p0 = scmp.eq.s32.totalorder %s1745_s30, 0 }
  0x5d   : > { %p2209_p7 = scmp.ne.s32.totalorder %s1709_s1, %s1705_s0  ;;  %s404_s10 = sand.u32 1, %s1745_s30  }
  0x5e   : > { %p156_p13 = por %p154_p2, %p2208_p0  ;;  %s1100_s27 = sshll.u32 %s1741_s29, 2 }
  0x5f   : > { %p2029_p9 = por %p295_p8, %p2209_p7  ;;  %s405_s13 = scalar_lea.sflag [#allocation11], %s404_s10 }
  0x61   : > { %s2206_s18 = int_to_ptr.vmem [resolvable:$true] %s2205_s19  ;;  %s406_s19 = sand.u32 1, %s1713_s23  }
  0x62   : > { %1352 = dma.hbm_to_vmem [thread:$0]  (!%p1940_p4), %s393_s5, 1024, %s2206_s18, %s375_s6, %s2204_s12, %s2204_s12, %s2203_s16  }
  0x63   : > { %s1099_s26 = sshll.u32 %s406_s19, 2  ;;  %s412_s6 = scalar_lea.hbm %s2160_s4, %s1100_s27 }
  0x64   : > { %s414_s17 = sshll.u32 %s412_s6, 4  ;;  %s408_s8 = scalar_lea.vmem [#allocation10], %s1099_s26  ;;  %s415_s17 = int_to_ptr.hbm [resolvable:$true] %s414_s17 }
  0x65   : > { %s416_s22 = sshll.u32 %s408_s8, 4  ;;  %p2211_p4 = scmp.lt.s32.totalorder %s1745_s30, 6  ;;  %s417_s22 = int_to_ptr.vmem [resolvable:$true] %s416_s22 }
  0x66   : > { %425 = sbr.rel (%p1885_p3) target bundleno = 671 (0x29f), region = 52  ;;  %s427_s16 = sand.u32 (!%p1885_p3), 1, %s1721_s25  }
  0x67   : > { %p1353_p2 = pnand %p2211_p4, %p156_p13  ;;  %s1102_s12 = sshll.u32 (!%p1885_p3), %s427_s16, 6 }
  0x68   : > { %s428_s19 = scalar_lea.sflag (!%p1885_p3), [#allocation8], %s427_s16  ;;  %s2043_s3 = scalar_lea.vmem (!%p1885_p3), [#allocation7], %s1102_s12 }
  0x69   : > { %1355 = dma.hbm_to_vmem [thread:$0]  (!%p1353_p2), %s415_s17, 64, %s417_s22, %s405_s13  }
  0x6b   : > { %1684 = dma.done.wait (%p1918_p12), %s428_s19, 1024  }
  0x6c   : > { %1686 = vsyncadd (%p1918_p12), %s428_s19, 4294966272  ;;  %s437_s10 = sand.u32 1, %s1877_s11   ;;  %s439_s26 = sand.u32 1, %s1709_s1  }
  0x6d   : > { %s2053_s15 = sshll.u32 %s439_s26, 2  ;;  %s438_s27 = scalar_lea.sflag [#allocation11], %s437_s10 }
  0x6e   : > { %s441_s18 = scalar_lea.vmem [#allocation10], %s2053_s15 }
  0x6f   : > { %1688 = dma.done.wait (%p1989_p5), %s438_s27, 64  }
  0x70   : > { %1690 = vsyncadd (%p1989_p5), %s438_s27, 4294967232  ;;  %p2212_p3 = scmp.eq.s32.totalorder %s1877_s11, 0 }
  0x72   : > { %1692 = dma.done.wait (%p2212_p3), [#allocation11], 2048   ;;  %p2213_p12 = pmov %p2212_p3 }
  0x73   : > { %p2214_p6 = pmov %p2212_p3 }
  0x74   : > { %1694 = vsyncadd (%p2213_p12), [#allocation11], 4294965248 }
  0x75   : > { %1696 = dma.done.wait (%p2214_p6), [#allocation14], 2048   ;;  %p2215_p10 = pmov %p2212_p3 }
  0x76   : > { %s2216_s21 = sld [smem:[#allocation27_spill]]  ;;  %s500_s19 = scalar_lea.vmem [#allocation15], %s2053_s15 }
  0x77   : > { %1698 = vsyncadd (%p2215_p10), [#allocation14], 4294965248  ;;  %s2217_s5 = sld [smem:[#allocation26_spill]] }
  0x78   : > { %s2218_s12 = sld [smem:[#allocation31_spill]] }
  0x7c   : > { %s501_s6 = sld [smem:[#allocation5 + %s2216_s21]] }
  0x7d   : > { %s507_s17 = sld [smem:[#allocation4 + %s2216_s21]]  ;;  %p1108_p0 = scmp.ne.s32.totalorder %s2217_s5, 0 }
  0x82   : > { %s1107_s2 = sadd.s32 4294967295, %s501_s6 }
  0x83   : > { %p503_p5 = scmp.gt.s32.totalorder %s1107_s2, 0 }
  0x85   : > { %s2258_s2 = smov (!%p503_p5, %s1107_s2), 0 }
  0x86   : > { %p505_p11 = scmp.lt.s32.totalorder %s2217_s5, %s2258_s2 }
  0x88   : > { %s506_s8 = scalar_select %p505_p11, %s2217_s5, %s2258_s2 }
  0x8a   : > { %s508_s22 = sadd.s32 %s507_s17, %s506_s8  ;;  %532 = sbr.rel (%p1108_p0) target bundleno = 145 (0x91), region = 72 }
  0x8b   : > { %p509_p8 = scmp.lt.s32.totalorder %s508_s22, 2 }
  0x8d   : > { %s2260_s22 = smov (!%p509_p8, %s508_s22), 2 }
  0x8e   : > { %s511_s11 = scalar_lea.vmem %s2218_s12, %s2260_s22 }
  0x8f   : > { %v1755_v0 = vmov 0.0  }
  0x90   : > { %533 = vst [vmem:[#allocation2] sm:$0xff] %v1755_v0 }
  0x91 PF: > { %s2219_s10 = sld [smem:[#allocation27_spill]] }
  0x92   : > { %s2220_s21 = sld [smem:[#allocation26_spill]] }
  0x97   : > { %s534_s27 = sld [smem:[#allocation5 + %s2219_s10]] }
  0x9d   : > { %p1109_p13 = scmp.ge.s32.totalorder %s2220_s21, %s534_s27 }
  0x9e   : > { %s2221_s6 = sld [smem:[#allocation27_spill]] (!%p1109_p13) }
  0x9f   : > { %538 = sbr.rel (%p1109_p13) target bundleno = 330 (0x14a), region = 76 }
  0xa4   : > { %v1287_v1 = vld [vmem:[%s2043_s3 + $0x38] sm:$0xff]  ;;  %v1286_v2 = vld [vmem:[%s2043_s3 + $0x30] sm:$0xff]  ;;  %v1285_v3 = vld [vmem:[%s2043_s3 + $0x28] sm:$0xff]  ;;  %s1110_s5 = sshll.u32 %s2221_s6, 3  ;;  %v543_v10 = vlaneseq  ;;  %v1756_v15 = vmov 1.0|1.0  }
  0xa5   : > { %615 = vmatpush.bf16.msra.mxu0 %v1287_v1  ;;  %v1284_v4 = vld [vmem:[%s2043_s3 + $0x20] sm:$0xff]  ;;  %v1283_v5 = vld [vmem:[%s2043_s3 + $0x18] sm:$0xff]  ;;  %v541_v7 = vstv %s1110_s5  ;;  %v1282_v8 = vld [vmem:[%s2043_s3 + $0x10] sm:$0xff] }
  0xa6   : > { %v539_v6 = vld [vmem:[%s511_s11] sm:$0x1]  ;;  %v1281_v11 = vld [vmem:[%s2043_s3 + $0x8] sm:$0xff]  ;;  %v544_v12 = vshrl.u32 %v543_v10, 7  ;;  %v1280_v14 = vld [vmem:[%s2043_s3] sm:$0xff] }
  0xa7   : > { %v542_v9 = vsub.s32 %v539_v6, %v541_v7  ;;  %v550_v16 = vld [vmem:[#allocation2] sm:$0xff] }
  0xa9   : > { %616 = vmatpush.bf16.msra.mxu0 %v1286_v2  ;;  %v545_v13 = vperm.slane %v542_v9, 0 }
  0xab   : > { %vm546_vm0 = vcmp.eq.s32.totalorder %v544_v12, %v545_v13 }
  0xac   : > { %vm1144_vm1 = vmpackc.low %vm546_vm0, %vm546_vm0 }
  0xad   : > { %617 = vmatpush.bf16.msra.mxu0 %v1285_v3 }
  0xb1   : > { %618 = vmatpush.bf16.msra.mxu0 %v1284_v4 }
  0xb5   : > { %619 = vmatpush.bf16.msra.mxu0 %v1283_v5 }
  0xb9   : > { %620 = vmatpush.bf16.msra.mxu0 %v1282_v8 }
  0xbd   : > { %621 = vmatpush.bf16.msra.mxu0 %v1281_v11 }
  0xc1   : > { %622 = vmatpush.bf16.msra.mxu0 %v1280_v14 }
  0xc4   : > { %1145 = vmatmul.msk.bf16.vlgmr.msra.gmra.mxu0 %vm1144_vm1, %v1756_v15 }
 0x141   : > { %v624_v17 = vpop.f32.mrf.mxu0 }
 0x142   : > { %v628_v18 = vadd.f32 %v624_v17, %v550_v16 }
 0x144   : > { %629 = vst [vmem:[#allocation2] sm:$0xff] %v628_v18 }
 0x149   : > { %v626_v19 = vpop.f32.mrf.mxu0 }
 0x14a PF: > { %s2222_s2 = sld [smem:[#allocation26_spill]] }
 0x150   : > { %p1146_p7 = scmp.ne.s32.totalorder %s2222_s2, 1 }
 0x151   : > { %s2089_s3 = sld [smem:[#allocation6]] (!%p1146_p7) }
 0x152   : > { %633 = sbr.rel (%p1146_p7) target bundleno = 650 (0x28a), region = 80  ;;  %s2223_s22 = sld [smem:[#allocation34_spill]] (!%p1146_p7) }
 0x153   : > { %s2224_s12 = sld [smem:[#allocation36_spill]] (!%p1146_p7) }
 0x157   : > { %v1205_v20 = vld [vmem:[#allocation12 + $0x70] sm:$0xf]  ;;  %v1303_v21 = vld [vmem:[#allocation12 + $0x74] sm:$0xf0]  ;;  %v1302_v22 = vld [vmem:[#allocation12 + $0x74] sm:$0xf] }
 0x158   : > { %v1206_v23 = vor.u32 %v1303_v21, %v1205_v20  ;;  %v1207_v24 = vld [vmem:[#allocation12 + $0x78] sm:$0xf0]  ;;  %v1197_v25 = vld [vmem:[#allocation12 + $0x60] sm:$0xf]  ;;  %v1301_v26 = vld [vmem:[#allocation12 + $0x64] sm:$0xf0] }
 0x159   : > { %v1210_v27 = vor.u32 %v1302_v22, %v1207_v24  ;;  %v1300_v28 = vld [vmem:[#allocation12 + $0x64] sm:$0xf]  ;;  %v1199_v29 = vld [vmem:[#allocation12 + $0x68] sm:$0xf0]  ;;  %v1198_v30 = vor.u32 %v1301_v26, %v1197_v25  ;;  %v1189_v32 = vld [vmem:[#allocation12 + $0x50] sm:$0xf] }
 0x15a   : > { %745 = vmatpush.bf16.msra.mxu0 %v1206_v23  ;;  %v1202_v31 = vor.u32 %v1300_v28, %v1199_v29  ;;  %v1299_v33 = vld [vmem:[#allocation12 + $0x54] sm:$0xf0]  ;;  %v1298_v34 = vld [vmem:[#allocation12 + $0x54] sm:$0xf]  ;;  %v1191_v35 = vld [vmem:[#allocation12 + $0x58] sm:$0xf0] }
 0x15b   : > { %758 = vmatpush.bf16.msra.mxu1 %v1210_v27  ;;  %v1190_v36 = vor.u32 %v1299_v33, %v1189_v32  ;;  %v1194_v37 = vor.u32 %v1298_v34, %v1191_v35  ;;  %v1181_v38 = vld [vmem:[#allocation12 + $0x40] sm:$0xf]  ;;  %v1297_v39 = vld [vmem:[#allocation12 + $0x44] sm:$0xf0]  ;;  %v1296_v40 = vld [vmem:[#allocation12 + $0x44] sm:$0xf] }
 0x15c   : > { %v1183_v41 = vld [vmem:[#allocation12 + $0x48] sm:$0xf0]  ;;  %v1182_v42 = vor.u32 %v1297_v39, %v1181_v38  ;;  %v1311_v43 = vld [vmem:[#allocation13 + $0x38] sm:$0xff]  ;;  %v1173_v45 = vld [vmem:[#allocation12 + $0x30] sm:$0xf]  ;;  %s635_s17 = sadd.f32 1.0, %s2089_s3 }
 0x15d   : > { %v1186_v44 = vor.u32 %v1296_v40, %v1183_v41  ;;  %v1295_v46 = vld [vmem:[#allocation12 + $0x34] sm:$0xf0]  ;;  %v1294_v48 = vld [vmem:[#allocation12 + $0x34] sm:$0xf]  ;;  %v1175_v49 = vld [vmem:[#allocation12 + $0x38] sm:$0xf0]  ;;  %907 = vmatpush.bf16.msra.mxu2 %v1311_v43 }
 0x15e   : > { %746 = vmatpush.bf16.msra.mxu0 %v1198_v30  ;;  %v1319_v47 = vld [vmem:[#allocation13 + $0x78] sm:$0xff]  ;;  %v1310_v50 = vld [vmem:[#allocation13 + $0x30] sm:$0xff]  ;;  %v1174_v52 = vor.u32 %v1295_v46, %v1173_v45  ;;  %v1165_v53 = vld [vmem:[#allocation12 + $0x20] sm:$0xf]  ;;  %v1178_v55 = vor.u32 %v1294_v48, %v1175_v49  ;;  %v638_v63 = vstv %s635_s17 }
 0x15f   : > { %759 = vmatpush.bf16.msra.mxu1 %v1202_v31  ;;  %920 = vmatpush.bf16.msra.mxu3 %v1319_v47  ;;  %v1318_v51 = vld [vmem:[#allocation13 + $0x70] sm:$0xff]  ;;  %v636_v54 = vld [vmem:[%s441_s18] sm:$0xf]  ;;  %v1293_v56 = vld [vmem:[#allocation12 + $0x24] sm:$0xf0] }
 0x160   : > { %v1292_v57 = vld [vmem:[#allocation12 + $0x24] sm:$0xf]  ;;  %v1167_v58 = vld [vmem:[#allocation12 + $0x28] sm:$0xf0]  ;;  %v637_v60 = vunpack.c.l.bf16 %v636_v54  ;;  %v1166_v62 = vor.u32 %v1293_v56, %v1165_v53  ;;  %v1157_v1 = vld [vmem:[#allocation12 + $0x10] sm:$0xf] }
 0x161   : > { %908 = vmatpush.bf16.msra.mxu2 %v1310_v50  ;;  %v1309_v59 = vld [vmem:[#allocation13 + $0x28] sm:$0xff]  ;;  %v1170_v0 = vor.u32 %v1292_v57, %v1167_v58  ;;  %v1291_v2 = vld [vmem:[#allocation12 + $0x14] sm:$0xf0]  ;;  %v1290_v3 = vld [vmem:[#allocation12 + $0x14] sm:$0xf] }
 0x162   : > { %747 = vmatpush.bf16.msra.mxu0 %v1190_v36  ;;  %v1317_v61 = vld [vmem:[#allocation13 + $0x68] sm:$0xff]  ;;  %v1159_v4 = vld [vmem:[#allocation12 + $0x18] sm:$0xf0]  ;;  %v1308_v5 = vld [vmem:[#allocation13 + $0x20] sm:$0xff]  ;;  %v639_v6 = vmul.f32 %v638_v63, %v637_v60  ;;  %v1158_v8 = vor.u32 %v1291_v2, %v1157_v1 }
 0x163   : > { %760 = vmatpush.bf16.msra.mxu1 %v1194_v37  ;;  %921 = vmatpush.bf16.msra.mxu3 %v1318_v51  ;;  %v1316_v7 = vld [vmem:[#allocation13 + $0x60] sm:$0xff]  ;;  %v640_v9 = vld [vmem:[#allocation2] sm:$0xff]  ;;  %v1162_v10 = vor.u32 %v1290_v3, %v1159_v4  ;;  %v1289_v12 = vld [vmem:[#allocation12 + $0x4] sm:$0xf0] }
 0x164   : > { %v1149_v11 = vld [vmem:[#allocation12] sm:$0xf]  ;;  %v1288_v13 = vld [vmem:[#allocation12 + $0x4] sm:$0xf]  ;;  %v1151_v14 = vld [vmem:[#allocation12 + $0x8] sm:$0xf0]  ;;  %v641_v16 = vadd.f32 %v640_v9, %v639_v6 }
 0x165   : > { %909 = vmatpush.bf16.msra.mxu2 %v1309_v59  ;;  %v1307_v15 = vld [vmem:[#allocation13 + $0x18] sm:$0xff]  ;;  %v1150_v18 = vor.u32 %v1289_v12, %v1149_v11  ;;  %v1154_v19 = vor.u32 %v1288_v13, %v1151_v14  ;;  %v1306_v20 = vld [vmem:[#allocation13 + $0x10] sm:$0xff]  ;;  %v1305_v23 = vld [vmem:[#allocation13 + $0x8] sm:$0xff] }
 0x166   : > { %748 = vmatpush.bf16.msra.mxu0 %v1182_v42  ;;  %v1315_v17 = vld [vmem:[#allocation13 + $0x58] sm:$0xff]  ;;  %v642_v21 = vpack.c.bf16 %v641_v16, %v641_v16  ;;  %v1314_v22 = vld [vmem:[#allocation13 + $0x50] sm:$0xff]  ;;  %v1313_v24 = vld [vmem:[#allocation13 + $0x48] sm:$0xff] }
 0x167   : > { %761 = vmatpush.bf16.msra.mxu1 %v1186_v44  ;;  %922 = vmatpush.bf16.msra.mxu3 %v1317_v61  ;;  %v1304_v25 = vld [vmem:[#allocation13] sm:$0xff]  ;;  %v659_v27 = vld [vmem:[%s2223_s22] sm:$0x3] }
 0x168   : > { %v1312_v26 = vld [vmem:[#allocation13 + $0x40] sm:$0xff]  ;;  %v661_v28 = vperm.slane %v659_v27, 0  ;;  %v662_v29 = vperm.slane %v659_v27, 1  ;;  %v1464_v40 = vld [vmem:[%s2224_s12] ss:$0 sm:$0xff] }
 0x169   : > { %910 = vmatpush.bf16.msra.mxu2 %v1308_v5 }
 0x16a   : > { %749 = vmatpush.bf16.msra.mxu0 %v1174_v52 }
 0x16b   : > { %762 = vmatpush.bf16.msra.mxu1 %v1178_v55  ;;  %923 = vmatpush.bf16.msra.mxu3 %v1316_v7 }
 0x16d   : > { %911 = vmatpush.bf16.msra.mxu2 %v1307_v15 }
 0x16e   : > { %750 = vmatpush.bf16.msra.mxu0 %v1166_v62 }
 0x16f   : > { %763 = vmatpush.bf16.msra.mxu1 %v1170_v0  ;;  %924 = vmatpush.bf16.msra.mxu3 %v1315_v17 }
 0x171   : > { %912 = vmatpush.bf16.msra.mxu2 %v1306_v20 }
 0x172   : > { %751 = vmatpush.bf16.msra.mxu0 %v1158_v8 }
 0x173   : > { %764 = vmatpush.bf16.msra.mxu1 %v1162_v10  ;;  %925 = vmatpush.bf16.msra.mxu3 %v1314_v22 }
 0x175   : > { %913 = vmatpush.bf16.msra.mxu2 %v1305_v23 }
 0x176   : > { %752 = vmatpush.bf16.msra.mxu0 %v1150_v18 }
 0x177   : > { %765 = vmatpush.bf16.msra.mxu1 %v1154_v19  ;;  %926 = vmatpush.bf16.msra.mxu3 %v1313_v24 }
 0x179   : > { %753 = vmatmul.bf16.vlgmr.msra.gmra.mxu0 %v642_v21  ;;  %914 = vmatpush.bf16.msra.mxu2 %v1304_v25 }
 0x17a   : > { %766 = vmatmul.bf16.vlgmr.msra.gmra.mxu1 %v642_v21 }
 0x17b   : > { %927 = vmatpush.bf16.msra.mxu3 %v1312_v26 }
 0x1f6   : > { %v754_v30 = vpop.f32.mrf.mxu0 }
 0x1f7   : > { %v755_v31 = vadd.f32 %v754_v30, %v661_v28  ;;  %v767_v32 = vpop.f32.mrf.mxu1 }
 0x1f8   : > { %v768_v33 = vadd.f32 %v767_v32, %v662_v29 }
 0x1f9   : > { %v771_v34 = vmax.f32 %v755_v31, 0.0 }
 0x1fa   : > { %v772_v35 = vmax.f32 %v768_v33, 0.0 }
 0x1fb   : > { %v773_v36 = vpack.c.bf16 %v771_v34, %v771_v34 }
 0x1fc   : > { %v774_v37 = vpack.c.bf16 %v772_v35, %v772_v35 }
 0x1fd   : > { %915 = vmatmul.bf16.vlgmr.msra.gmra.mxu2 %v773_v36 }
 0x1fe   : > { %928 = vmatmul.bf16.vlgmr.msra.gmra.mxu3 %v774_v37  ;;  %v756_v38 = vpop.f32.mrf.mxu0 }
 0x1ff   : > { %v769_v39 = vpop.f32.mrf.mxu1 }
 0x280   : > { %v916_v41 = vpop.f32.mrf.mxu2 }
 0x281   : > { %v917_v42 = vadd.f32 %v1464_v40, %v916_v41  ;;  %v929_v43 = vpop.f32.mrf.mxu3 }
 0x283   : > { %v930_v44 = vadd.f32 %v929_v43, %v917_v42 }
 0x285   : > { %v933_v45 = vmax.f32 %v930_v44, 0.0 }
 0x287   : > { %v934_v46 = vpack.c.bf16 %v933_v45, %v933_v45 }
 0x288   : > { %v918_v47 = vpop.f32.mrf.mxu2 }
 0x289   : > { %935 = vst [vmem:[%s500_s19] sm:$0xf] %v934_v46  ;;  %v931_v48 = vpop.f32.mrf.mxu3 }
 0x28a PF: > { %s2225_s11 = sld [smem:[#allocation27_spill]]  ;;  %s949_s2 = sshll.u32 %s500_s19, 4  ;;  %s950_s2 = int_to_ptr.vmem [resolvable:$true] %s949_s2 }
 0x28b   : > { %s2226_s6 = sld [smem:[#allocation37_spill]]  ;;  %s937_s17 = scalar_lea.sflag [#allocation9], %s439_s26 }
 0x290   : > { %s1276_s10 = sshll.u32 %s2225_s11, 2 }
 0x291   : > { %s947_s5 = scalar_lea.hbm %s2226_s6, %s1276_s10  ;;  %s1629_s16 = scalar_lea.hbm %s2226_s6, 12 }
 0x292   : > { %s951_s3 = sshll.u32 %s947_s5, 4  ;;  %s952_s3 = int_to_ptr.hbm [resolvable:$true] %s951_s3 }
 0x293   : > { %s1623_s18 = sshra.s32 %s952_s3, 4  ;;  %s1624_s18 = int_to_ptr.hbm [resolvable:$true] %s1623_s18 }
 0x294   : > { %s1625_s8 = scalar_lea.hbm %s1624_s18, 4  ;;  %p1630_p12 = scmp.lt.s32.totalorder %s1624_s18, %s2226_s6 }
 0x295   : > { %p1626_p4 = scmp.ne.s32.totalorder %s1624_s18, %s1625_s8  ;;  %p1631_p6 = scmp.lt.s32.totalorder %s1629_s16, %s1625_s8 }
 0x297   : > { %p1627_p2 = pnand %p1626_p4, %p2016_p1  ;;  %p1632_p10 = por %p1631_p6, %p1630_p12 }
 0x299   : > { %p1628_p3 = pneg %p1627_p2 }
 0x29b   : > { %p1633_p5 = pnand %p1632_p10, %p1628_p3 }
 0x29d   : > { %1636 = shalt.err (!%p1633_p5)
}
 0x29e   : > { %1336 = dma.vmem_to_hbm [thread:$0]  (%p2016_p1), %s950_s2, 64, %s952_s3, %s937_s17  }
 0x29f PF: > { %p1365_p11 = scmp.ge.s32.totalorder %s1745_s30, 2  ;;  %s963_s26 = sand.u32 1, %s1705_s0  }
 0x2a0   : > { %s964_s15 = scalar_lea.sflag [#allocation9], %s963_s26 }
 0x2a1   : > { %p1357_p8 = pnand %p1365_p11, %p2029_p9 }
 0x2a3   : > { %p1358_p0 = pneg %p1357_p8 }
 0x2a5   : > { %1700 = dma.done.wait (%p1358_p0), %s964_s15, 64  }
 0x2a6   : > { %1702 = vsyncadd (%p1358_p0), %s964_s15, 4294967232  ;;  %s44_s30 = sadd.s32 1, %s1745_s30   ;;  %s2227_s20 = sld [smem:[#allocation28_spill]] }
 0x2a7   : > { %p41_p13 = scmp.ge.s32.totalorder %s44_s30, 8   ;;  %s2228_s19 = sld [smem:[#allocation29_spill]] }
 0x2a8   : > { %s2229_s0 = smov %s1709_s1  ;;  %s2230_s1 = smov %s1713_s23 }
 0x2a9   : > { %s2231_s23 = smov %s1974_s24  ;;  %s2232_s24 = smov %s1721_s25 }
 0x2aa   : > { %s2233_s25 = smov %s1725_s9  ;;  %s2234_s9 = smov %s1963_s14 }
 0x2ab   : > { %s2235_s26 = smov %s1737_s28  ;;  %s2236_s27 = smov %s1741_s29 }
 0x2ac   : > { %s2237_s28 = smov %s2227_s20  ;;  %43 = sbr.rel (!%p41_p13) target bundleno = 26 (0x1a), region = 133 }
 0x2ad   : > { %s2238_s29 = smov %s2228_s19 }
 0x2b1   :  { %970 = vsyncpa [#allocation8], 1 }
 0x2b2   :  { %972 = vsyncpa [#allocation8 + $0x1], 1 }
 0x2b3   :  { %973 = vsyncpa [#allocation11], 1 }
 0x2b4   :  { %975 = vsyncpa [#allocation11 + $0x1], 1 }
 0x2b5   :  { %976 = vsyncpa [#allocation14], 1 }
 0x2b6   :  { %977 = vsyncpa [#allocation9], 1 }
 0x2b7   :  { %979 = vsyncpa [#allocation9 + $0x1], 1 }

</bundles_post_ra>
